<compile_context>
chip_gen: v7x
topology: tpu7x:2x2x1
jax: 0.10.0
libtpu: 0.0.40
codegen_flags: <defaults>
</compile_context>

<pallas_src>
import jax
import jax.numpy as jnp
from jax.experimental import pallas as pl
from jax.experimental.pallas import tpu as pltpu


def policy_net_kernel(x_ref, w1_ref, b1_ref, w2_ref, b2_ref, w3_ref, b3_ref, o_ref):
    x = x_ref[...]                                                       # (TB, D_in)

    h1 = jnp.dot(x, w1_ref[...], preferred_element_type=jnp.float32)    # (TB, 20)
    h1 = jnp.maximum(h1 + b1_ref[...], 0.0)                             # ReLU

    h2 = jnp.dot(h1, w2_ref[...], preferred_element_type=jnp.float32)   # (TB, 20)
    h2 = jnp.maximum(h2 + b2_ref[...], 0.0)                             # ReLU

    logits = jnp.dot(h2, w3_ref[...],
                     preferred_element_type=jnp.float32) + b3_ref[...]  # (TB, D_out)

    # Numerically-stable softmax along the feature axis.
    m = jnp.max(logits, axis=-1, keepdims=True)
    e = jnp.exp(logits - m)
    s = jnp.sum(e, axis=-1, keepdims=True)
    r = pl.reciprocal(s, approx=True)       # EUP vrcp (otherwise-idle slot)
    r = r * (2.0 - s * r)                   # one Newton-Raphson step -> ~f32 accuracy
    o_ref[...] = e * r


def prepare_params(params):
    """One-time preprocessing: weights -> (in, out), biases -> (1, out)."""
    return {
        "w1": jnp.asarray(params["w1"]).T, "b1": jnp.asarray(params["b1"]).reshape(1, -1),
        "w2": jnp.asarray(params["w2"]).T, "b2": jnp.asarray(params["b2"]).reshape(1, -1),
        "w3": jnp.asarray(params["w3"]).T, "b3": jnp.asarray(params["b3"]).reshape(1, -1),
    }


def _batch_tile(batch, max_tile=1024):
    # Single block (== full dim) when small; otherwise a multiple-of-8 tile whose
    # double-buffered x (TB*32*4B*2) + out stays well under every chip's VMEM limit.
    return batch if batch <= max_tile else max_tile


def policy_network_forward(x, prepped):
    """x: (B, input_dim) float32. prepped: output of prepare_params()."""
    B, d_in = x.shape
    d_out = prepped["w3"].shape[1]
    TB = _batch_tile(B)
    grid = (pl.cdiv(B, TB),)

    # Resident (non-tiled) operands: same block every grid step.
    const = lambda shp: pl.BlockSpec(shp, lambda i: (0,) * len(shp))

    return pl.pallas_call(
        policy_net_kernel,
        out_shape=jax.ShapeDtypeStruct((B, d_out), jnp.float32),
        grid=grid,
        in_specs=[
            pl.BlockSpec((TB, d_in), lambda i: (i, 0)),       # x: tiled over batch
            const(prepped["w1"].shape), const(prepped["b1"].shape),
            const(prepped["w2"].shape), const(prepped["b2"].shape),
            const(prepped["w3"].shape), const(prepped["b3"].shape),
        ],
        out_specs=pl.BlockSpec((TB, d_out), lambda i: (i, 0)),
        compiler_params=pltpu.CompilerParams(
            dimension_semantics=("parallel",),                # shard batch across TCs (v7x)
        ),
    )(x, prepped["w1"], prepped["b1"], prepped["w2"], prepped["b2"],
      prepped["w3"], prepped["b3"])


def init_params(key, input_dim, output_dim, hidden=20):
    # Deterministic synthetic init (uniform like PyTorch's default Linear init range).
    ks = jax.random.split(key, 6)

    def lin(kw, kb, fan_in, fan_out):
        bound = 1.0 / jnp.sqrt(fan_in)
        w = jax.random.uniform(kw, (fan_out, fan_in), jnp.float32, -bound, bound)
        b = jax.random.uniform(kb, (fan_out,), jnp.float32, -bound, bound)
        return w, b

    w1, b1 = lin(ks[0], ks[1], input_dim, hidden)
    w2, b2 = lin(ks[2], ks[3], hidden, hidden)
    w3, b3 = lin(ks[4], ks[5], hidden, output_dim)
    return {"w1": w1, "b1": b1, "w2": w2, "b2": b2, "w3": w3, "b3": b3}


def reference_forward(x, p):
    h1 = jnp.maximum(x @ p["w1"].T + p["b1"], 0.0)
    h2 = jnp.maximum(h1 @ p["w2"].T + p["b2"], 0.0)
    logits = h2 @ p["w3"].T + p["b3"]
    return jax.nn.softmax(logits, axis=1)


if __name__ == "__main__":
    key = jax.random.PRNGKey(0)
    k_x, k_p = jax.random.split(key)

    batch, input_dim, output_dim = 8, 32, 4
    x = jax.random.normal(k_x, (batch, input_dim), jnp.float32)
    params = init_params(k_p, input_dim, output_dim)

    prepped = prepare_params(params)   # one-time; hoisted out of the per-call path

    out = policy_network_forward(x, prepped)
    out = jax.block_until_ready(out)

    ref = reference_forward(x, params)
    assert out.shape == (batch, output_dim)
    assert jnp.allclose(out, ref, atol=1e-5, rtol=1e-5), "mismatch vs reference"
    assert jnp.allclose(jnp.sum(out, axis=1), 1.0, atol=1e-5), "softmax rows must sum to 1"

    print("KERNEL_OK")
</pallas_src>

<mosaic_0001>
module attributes {stable_mosaic.version = 11 : i64} {
  func.func @policy_net_kernel(%arg0: i32, %arg1: memref<8x32xf32, #tpu.memory_space<vmem>>, %arg2: memref<32x20xf32, #tpu.memory_space<vmem>>, %arg3: memref<1x20xf32, #tpu.memory_space<vmem>>, %arg4: memref<20x20xf32, #tpu.memory_space<vmem>>, %arg5: memref<1x20xf32, #tpu.memory_space<vmem>>, %arg6: memref<20x4xf32, #tpu.memory_space<vmem>>, %arg7: memref<1x4xf32, #tpu.memory_space<vmem>>, %arg8: memref<8x4xf32, #tpu.memory_space<vmem>>) attributes {dimension_semantics = [#tpu.dimension_semantics<parallel>], iteration_bounds = array<i64: 1>, scalar_prefetch = 0 : i64, scratch_operands = 0 : i64, tpu.core_type = #tpu.core_type<tc>, window_params = [{transform_indices = @transform_0, window_bounds = array<i64: 8, 32>}, {pipeline_mode = #tpu.pipeline_mode<synchronous>, transform_indices = @transform_1, window_bounds = array<i64: 32, 20>}, {pipeline_mode = #tpu.pipeline_mode<synchronous>, transform_indices = @transform_2, window_bounds = array<i64: 1, 20>}, {pipeline_mode = #tpu.pipeline_mode<synchronous>, transform_indices = @transform_3, window_bounds = array<i64: 20, 20>}, {pipeline_mode = #tpu.pipeline_mode<synchronous>, transform_indices = @transform_4, window_bounds = array<i64: 1, 20>}, {pipeline_mode = #tpu.pipeline_mode<synchronous>, transform_indices = @transform_5, window_bounds = array<i64: 20, 4>}, {pipeline_mode = #tpu.pipeline_mode<synchronous>, transform_indices = @transform_6, window_bounds = array<i64: 1, 4>}, {transform_indices = @transform_7, window_bounds = array<i64: 8, 4>}]} {
    %c0 = arith.constant 0 : index
    %c0_0 = arith.constant 0 : index
    %0 = vector.load %arg1[%c0, %c0_0] : memref<8x32xf32, #tpu.memory_space<vmem>>, vector<8x32xf32>
    %c0_1 = arith.constant 0 : index
    %c0_2 = arith.constant 0 : index
    %1 = vector.load %arg2[%c0_1, %c0_2] : memref<32x20xf32, #tpu.memory_space<vmem>>, vector<32x20xf32>
    %cst = arith.constant dense<0.000000e+00> : vector<8x20xf32>
    %2 = tpu.matmul %0, %1, %cst {dimension_numbers = #tpu.dot_dimension_numbers<[1], [0], [0], [1], [0, 0, 1, 1], [], []>} : vector<8x32xf32>, vector<32x20xf32>, vector<8x20xf32> -> vector<8x20xf32>
    %c0_3 = arith.constant 0 : index
    %c0_4 = arith.constant 0 : index
    %3 = vector.load %arg3[%c0_3, %c0_4] : memref<1x20xf32, #tpu.memory_space<vmem>>, vector<1x20xf32>
    %4 = vector.broadcast %3 : vector<1x20xf32> to vector<8x20xf32>
    %5 = arith.addf %2, %4 : vector<8x20xf32>
    %cst_5 = arith.constant 0.000000e+00 : f32
    %6 = vector.broadcast %cst_5 : f32 to vector<8x20xf32>
    %7 = arith.maximumf %5, %6 : vector<8x20xf32>
    %c0_6 = arith.constant 0 : index
    %c0_7 = arith.constant 0 : index
    %8 = vector.load %arg4[%c0_6, %c0_7] : memref<20x20xf32, #tpu.memory_space<vmem>>, vector<20x20xf32>
    %cst_8 = arith.constant dense<0.000000e+00> : vector<8x20xf32>
    %9 = tpu.matmul %7, %8, %cst_8 {dimension_numbers = #tpu.dot_dimension_numbers<[1], [0], [0], [1], [0, 0, 1, 1], [], []>} : vector<8x20xf32>, vector<20x20xf32>, vector<8x20xf32> -> vector<8x20xf32>
    %c0_9 = arith.constant 0 : index
    %c0_10 = arith.constant 0 : index
    %10 = vector.load %arg5[%c0_9, %c0_10] : memref<1x20xf32, #tpu.memory_space<vmem>>, vector<1x20xf32>
    %11 = vector.broadcast %10 : vector<1x20xf32> to vector<8x20xf32>
    %12 = arith.addf %9, %11 : vector<8x20xf32>
    %cst_11 = arith.constant 0.000000e+00 : f32
    %13 = vector.broadcast %cst_11 : f32 to vector<8x20xf32>
    %14 = arith.maximumf %12, %13 : vector<8x20xf32>
    %c0_12 = arith.constant 0 : index
    %c0_13 = arith.constant 0 : index
    %15 = vector.load %arg6[%c0_12, %c0_13] : memref<20x4xf32, #tpu.memory_space<vmem>>, vector<20x4xf32>
    %cst_14 = arith.constant dense<0.000000e+00> : vector<8x4xf32>
    %16 = tpu.matmul %14, %15, %cst_14 {dimension_numbers = #tpu.dot_dimension_numbers<[1], [0], [0], [1], [0, 0, 1, 1], [], []>} : vector<8x20xf32>, vector<20x4xf32>, vector<8x4xf32> -> vector<8x4xf32>
    %c0_15 = arith.constant 0 : index
    %c0_16 = arith.constant 0 : index
    %17 = vector.load %arg7[%c0_15, %c0_16] : memref<1x4xf32, #tpu.memory_space<vmem>>, vector<1x4xf32>
    %18 = vector.broadcast %17 : vector<1x4xf32> to vector<8x4xf32>
    %19 = arith.addf %16, %18 : vector<8x4xf32>
    %cst_17 = arith.constant dense<0xFF800000> : vector<8xf32>
    %20 = vector.multi_reduction <maximumf>, %19, %cst_17 [1] : vector<8x4xf32> to vector<8xf32>
    %21 = vector.shape_cast %20 : vector<8xf32> to vector<8x1xf32>
    %22 = vector.broadcast %21 : vector<8x1xf32> to vector<8x4xf32>
    %23 = arith.subf %19, %22 : vector<8x4xf32>
    %24 = math.exp %23 : vector<8x4xf32>
    %cst_18 = arith.constant dense<0.000000e+00> : vector<8xf32>
    %25 = vector.multi_reduction <add>, %24, %cst_18 [1] : vector<8x4xf32> to vector<8xf32>
    %26 = vector.shape_cast %25 : vector<8xf32> to vector<8x1xf32>
    %27 = tpu.reciprocal %26 {approx = true} : vector<8x1xf32> -> vector<8x1xf32>
    %28 = arith.mulf %26, %27 : vector<8x1xf32>
    %cst_19 = arith.constant 2.000000e+00 : f32
    %29 = vector.broadcast %cst_19 : f32 to vector<8x1xf32>
    %30 = arith.subf %29, %28 : vector<8x1xf32>
    %31 = arith.mulf %27, %30 : vector<8x1xf32>
    %32 = vector.broadcast %31 : vector<8x1xf32> to vector<8x4xf32>
    %33 = arith.mulf %24, %32 : vector<8x4xf32>
    %c0_20 = arith.constant 0 : index
    %c0_21 = arith.constant 0 : index
    %34 = vector.load %arg8[%c0_20, %c0_21] : memref<8x4xf32, #tpu.memory_space<vmem>>, vector<8x4xf32>
    tpu.vector_store %arg8[%c0_20, %c0_21], %33 {strides = array<i32>} : memref<8x4xf32, #tpu.memory_space<vmem>>, vector<8x4xf32>,
    return
  }
  func.func @transform_0(%arg0: i32) -> (i32, i32) {
    %c0_i32 = arith.constant 0 : i32
    %c0_i32_0 = arith.constant 0 : i32
    return %arg0, %c0_i32 : i32, i32
  }
  func.func @transform_1(%arg0: i32) -> (i32, i32) {
    %c0_i32 = arith.constant 0 : i32
    %c0_i32_0 = arith.constant 0 : i32
    %c0_i32_1 = arith.constant 0 : i32
    return %c0_i32, %c0_i32_0 : i32, i32
  }
  func.func @transform_2(%arg0: i32) -> (i32, i32) {
    %c0_i32 = arith.constant 0 : i32
    %c0_i32_0 = arith.constant 0 : i32
    %c0_i32_1 = arith.constant 0 : i32
    return %c0_i32, %c0_i32_0 : i32, i32
  }
  func.func @transform_3(%arg0: i32) -> (i32, i32) {
    %c0_i32 = arith.constant 0 : i32
    %c0_i32_0 = arith.constant 0 : i32
    %c0_i32_1 = arith.constant 0 : i32
    return %c0_i32, %c0_i32_0 : i32, i32
  }
  func.func @transform_4(%arg0: i32) -> (i32, i32) {
    %c0_i32 = arith.constant 0 : i32
    %c0_i32_0 = arith.constant 0 : i32
    %c0_i32_1 = arith.constant 0 : i32
    return %c0_i32, %c0_i32_0 : i32, i32
  }
  func.func @transform_5(%arg0: i32) -> (i32, i32) {
    %c0_i32 = arith.constant 0 : i32
    %c0_i32_0 = arith.constant 0 : i32
    %c0_i32_1 = arith.constant 0 : i32
    return %c0_i32, %c0_i32_0 : i32, i32
  }
  func.func @transform_6(%arg0: i32) -> (i32, i32) {
    %c0_i32 = arith.constant 0 : i32
    %c0_i32_0 = arith.constant 0 : i32
    %c0_i32_1 = arith.constant 0 : i32
    return %c0_i32, %c0_i32_0 : i32, i32
  }
  func.func @transform_7(%arg0: i32) -> (i32, i32) {
    %c0_i32 = arith.constant 0 : i32
    %c0_i32_0 = arith.constant 0 : i32
    return %arg0, %c0_i32 : i32, i32
  }
}

</mosaic_0001>

<bundles_post_ra>
// kernel: tpu_custom_call.1
= control target key start
LH: loop header
LB: loop body
LE: loop exit
PB: predicated region body
PF: predicated region fallthrough
CT: control target
= control target key end

     0   :  { %v377_v0 = vmov 0.0|0.0   ;;  %vm378_vm0 = vmmov 0   ;;  %v379_v4 = vmov 0.0   ;;  %vm38_vm1 = vcmask 261120   ;;  %s473_s1 = inlined_call_operand.vmem [shape: f32[32,20], index: 1, kind: input, shape index: {}]   ;;  %s474_s0 = inlined_call_operand.vmem [shape: f32[8,32], index: 0, kind: input, shape index: {}]   ;;  %s475_s3 = inlined_call_operand.vmem [shape: f32[20,20], index: 3, kind: input, shape index: {}]   ;;  %s476_s2 = inlined_call_operand.vmem [shape: f32[1,20], index: 2, kind: input, shape index: {}]   ;;  %s477_s5 = inlined_call_operand.vmem [shape: f32[20,4], index: 5, kind: input, shape index: {}]   ;;  %s478_s4 = inlined_call_operand.vmem [shape: f32[1,20], index: 4, kind: input, shape index: {}]   ;;  %s479_s6 = inlined_call_operand.vmem [shape: f32[1,4], index: 6, kind: input, shape index: {}]   ;;  %s480_s7 = inlined_call_operand.vmem [shape: f32[8,4], index: 7, kind: output, shape index: {}]  }
   0x1   :  { %358 = vmatprep.subr.bf16.mxu0 %v377_v0  ;;  %v27_v1 = vld [vmem:[%s473_s1] sm:$0xff]  ;;  %v28_v2 = vld [vmem:[%s473_s1 + $0x8] sm:$0xff]  ;;  %v29_v3 = vld [vmem:[%s473_s1 + $0x10] sm:$0xff]  ;;  %337 = vmatprep.mubr.msk.f32.mxu0 %vm378_vm0, %v379_v4  ;;  %vm127_vm2 = vcmask 1043456   ;;  %vm123_vm3 = vcmask 162816   ;;  %vm288_vm4 = vcmask 31744  }
   0x2   :  { %v359_v5 = vpack.c.bf16 %v28_v2, %v27_v1  ;;  %v30_v6 = vld [vmem:[%s473_s1 + $0x18] sm:$0xff]  ;;  %364 = vmatprep.subr.bf16.mxu1 %v377_v0  ;;  %346 = vmatprep.mubr.msk.f32.mxu1 %vm378_vm0, %v379_v4  ;;  %v26_v8 = vld [vmem:[%s474_s0] sm:$0xff]  ;;  %v114_v10 = vld [vmem:[%s475_s3 + $0x8] sm:$0xff] }
   0x3   :  { %v362_v7 = vpack.c.bf16 %v30_v6, %v29_v3  ;;  %v113_v9 = vld [vmem:[%s475_s3] sm:$0xff]  ;;  %v115_v12 = vld [vmem:[%s475_s3 + $0x10] sm:$0xf]  ;;  %v203_v15 = vld [vmem:[%s477_s5 + $0x8] sm:$0xff] }
   0x4   :  { %360 = vmatpush3.bf16.msra.mxu0 %v359_v5  ;;  %v365_v11 = vpack.c.bf16 %v114_v10, %v113_v9  ;;  %v308_v13 = vld [vmem:[%s476_s2] ss:$0 sm:$0xff]  ;;  %v204_v21 = vld [vmem:[%s477_s5 + $0x10] sm:$0xf] }
   0x5   :  { %361 = vmatprep.subr.bf16.mxu0 %v377_v0  ;;  %v202_v14 = vld [vmem:[%s477_s5] sm:$0xff] }
   0x6   :  { %366 = vmatpush3.bf16.msra.mxu1 %v365_v11  ;;  %v368_v19 = vpack.c.bf16 %v203_v15, %v202_v14  ;;  %v310_v22 = vld [vmem:[%s478_s4] ss:$0 sm:$0xff] }
   0x7   :  { %344 = vmatprep.subr.mxu1 %v379_v4  ;;  %v313_v27 = vld [vmem:[%s479_s6] ss:$0 sm:$0xff] }
   0x8   :  { %363 = vmatpush3.bf16.msra.mxu0 %v362_v7 }
   0xa   :  { %345 = vmatpush3.msk.msra.mxu1 %vm127_vm2, %v115_v12 }
   0xb   :  { %338 = vmatmul.mubr.msk.f32.vlgmr.msra.gmra.mrb[0].mxu0 %vm38_vm1, %v26_v8  ;;  %367 = vmatprep.subr.bf16.mxu1 %v377_v0 }
  0xde   :  { %v108_v16 = vpop.f32.mrb[0].mxu0 }
  0xdf   :  { %v109_v17 = vadd.f32 %v308_v13, %v108_v16  ;;  %v339_v18 = vpop.f32.mrb[1].mxu0 }
  0xe1   :  { %v112_v20 = vmax.f32 %v109_v17, 0.0 }
  0xe3   :  { %347 = vmatmul.mubr.msk.f32.vlgmr.msra.gmra.mrb[0].mxu1 %vm123_vm3, %v112_v20 }
  0xe4   :  { %369 = vmatpush3.bf16.msra.mxu1 %v368_v19  ;;  %355 = vmatprep.mubr.msk.f32.mxu1 %vm378_vm0, %v379_v4 }
  0xe5   :  { %353 = vmatprep.subr.mxu1 %v379_v4 }
  0xe8   :  { %354 = vmatpush3.msk.msra.mxu1 %vm127_vm2, %v204_v21 }
 0x1b6   :  { %v197_v23 = vpop.f32.mrb[0].mxu1 }
 0x1b7   :  { %v198_v24 = vadd.f32 %v310_v22, %v197_v23  ;;  %v348_v25 = vpop.f32.mrb[1].mxu1 }
 0x1b9   :  { %v201_v26 = vmax.f32 %v198_v24, 0.0 }
 0x1bb   :  { %356 = vmatmul.mubr.msk.f32.vlgmr.msra.gmra.mrb[2].mxu1 %vm123_vm3, %v201_v26 }
 0x28e   :  { %v284_v28 = vpop.f32.mrb[2].mxu1 }
 0x28f   :  { %v285_v29 = vadd.f32 %v313_v27, %v284_v28  ;;  %v357_v30 = vpop.f32.mrb[3].mxu1 }
 0x291   :  { %v289_v31 = vsel %vm288_vm4, %v285_v29, -inf }
 0x292   :  { %290 = vmax.xlane.f32.xlu0 %v289_v31 }
 0x31f   :  { %v291_v32 = vpop.xlane.xlu0 %290 }
 0x320   :  { %v292_v33 = vsub.f32 %v285_v29, %v291_v32 }
 0x322   :  { %v293_v34 = vmul.f32 1.442695, %v292_v33 }
 0x324   :  { %373 = vpow2.f32 %v293_v34 }
 0x32e   :  { %v374_v35 = vpop.eup %373 }
 0x32f   :  { %v295_v36 = vsel %vm288_vm4, %v374_v35, 0.0 }
 0x330   :  { %296 = vadd.xlane.f32.xlu0 %v295_v36 }
 0x3bd   :  { %v297_v37 = vpop.xlane.xlu0 %296 }
 0x3be   :  { %375 = vrcp.f32 %v297_v37 }
 0x3c8   :  { %v376_v38 = vpop.eup %375 }
 0x3c9   :  { %v299_v39 = vmul.f32 %v376_v38, %v297_v37 }
 0x3cb   :  { %v300_v40 = vsub.f32 2.0, %v299_v39 }
 0x3cd   :  { %v301_v41 = vmul.f32 %v376_v38, %v300_v40 }
 0x3cf   :  { %v302_v42 = vmul.f32 %v374_v35, %v301_v41 }
 0x3d1   :  { %303 = vst.msk [vmem:[%s480_s7] sm:$0xff] %vm288_vm4, %v302_v42 }

</bundles_post_ra>
